<compile_context>
chip_gen: v7x
topology: tpu7x:2x2x1
jax: 0.10.0
libtpu: 0.0.40
codegen_flags: <defaults>
</compile_context>

<pallas_src>
import functools

import jax
import jax.numpy as jnp
import numpy as np
from jax.experimental import pallas as pl
from jax.experimental.pallas import tpu as pltpu


def _upsample_rows_kernel(x_ref, o_ref, *, w, s, passes):
    """One grid step: R input rows of width w -> R output rows of width s*s*w."""
    x = x_ref[...].astype(jnp.float32)                     # (R, w)

    # 0/1 column-selection matrix, built in-kernel (no HBM constant / DMA):
    #   sel[j, b] = 1  iff  b lands in column-group j  ->  (x @ sel)[:, b] == x[:, b // s]
    dst = jax.lax.broadcasted_iota(jnp.int32, (w, s * w), 1)
    src = jax.lax.broadcasted_iota(jnp.int32, (w, s * w), 0)
    hit = (dst >= s * src) & (dst < s * (src + 1))
    sel = jnp.where(hit, 1.0, 0.0).astype(jnp.bfloat16)

    # Exact selection with `passes` bf16 MXU passes.  sel is exactly 0/1 and each
    # x piece is exactly bf16-representable, so every pass (and the f32
    # accumulation) is exact; residual error is < ~2^-27 relative.
    rem = x
    y = jnp.zeros((x.shape[0], s * w), jnp.float32)
    for _ in range(passes):
        piece = rem.astype(jnp.bfloat16)
        y = y + jnp.dot(piece, sel, preferred_element_type=jnp.float32)
        rem = rem - piece.astype(jnp.float32)

    # Row duplication is a pure copy: s concatenated copies along the lane dim
    # (this IS the contiguous layout of the s replicated output rows).
    o_ref[...] = jnp.concatenate([y] * s, axis=-1).astype(o_ref.dtype)


def _pick_block_rows(rows, w, s, itemsize):
    """Rows per grid step: as large as a conservative VMEM budget allows."""
    if rows <= 8:
        return rows                              # block dim == full dim is legal
    w_pad = -(-w // 128) * 128                   # lane padding of VMEM tiles
    ow_pad = -(-(s * s * w) // 128) * 128
    budget = 8 * 1024 * 1024                     # safe for v7x / v5e scoped VMEM
    per_row = 2 * (w_pad + ow_pad) * max(itemsize, 4)   # double-buffered in + out (f32 compute)
    r = max(8, budget // per_row)
    r = min(r, 2048)
    r = min(r, -(-rows // 2))                    # keep >= 2 grid steps (megacore)
    r = max(8, (r // 8) * 8)
    return min(r, rows)


def upsample_nearest(x, scale_factor):
    """Nearest-neighbour upsample of an NCHW tensor by an integer scale factor."""
    s = int(scale_factor)
    if s < 1 or s != scale_factor:
        raise ValueError("scale_factor must be a positive integer")
    n, c, h, w = x.shape
    out_shape = (n, c, s * h, s * w)
    if n * c * h * w == 0:                       # e.g. empty 'inp' when C == 1
        return jnp.zeros(out_shape, x.dtype)
    if s == 1:
        return x

    rows = n * c * h
    xr = x.reshape(rows, w)                      # contiguous view, free
    itemsize = jnp.dtype(x.dtype).itemsize
    passes = 1 if x.dtype == jnp.bfloat16 else 3
    r = _pick_block_rows(rows, w, s, itemsize)
    grid = (pl.cdiv(rows, r),)

    out2d = pl.pallas_call(
        functools.partial(_upsample_rows_kernel, w=w, s=s, passes=passes),
        out_shape=jax.ShapeDtypeStruct((rows, s * s * w), x.dtype),
        grid=grid,
        in_specs=[pl.BlockSpec((r, w), lambda i: (i, 0))],
        out_specs=pl.BlockSpec((r, s * s * w), lambda i: (i, 0)),
        compiler_params=pltpu.CompilerParams(
            dimension_semantics=("parallel",),
            vmem_limit_bytes=32 * 1024 * 1024),
    )(xr)
    # (rows, s*s*w) is exactly the contiguous row-major layout of (n,c,s*h,s*w).
    return out2d.reshape(out_shape)


class PartialUpsample:
    """JAX/Pallas port of lisl.pl.model.PartialUpsample (forward pass only)."""

    def __init__(self, scale_factor=2, mode="nearest"):
        if mode != "nearest":
            # TODO(synk): only 'nearest' interpolation is implemented
            # (bilinear etc. would need a different kernel).
            raise NotImplementedError("only mode='nearest' is supported")
        self.scale_factor = scale_factor

    def __call__(self, inputs):
        if isinstance(inputs, (list, tuple)):
            inp, mask = inputs
        else:
            mid = inputs.shape[1] // 2
            # Same Python slicing as the PyTorch module, incl. mid == 0
            # (empty inp, full mask).
            inp = inputs[:, :-mid] if mid > 0 else inputs[:, :0]
            mask = inputs[:, -mid:]
        return (upsample_nearest(inp, self.scale_factor),
                upsample_nearest(mask, self.scale_factor))


if __name__ == "__main__":
    key = jax.random.PRNGKey(0)
    N, C, H, W = 2, 4, 16, 16
    x = jax.random.normal(key, (N, C, H, W), dtype=jnp.float32)

    model = PartialUpsample(scale_factor=2, mode="nearest")
    up_inp, up_mask = model(x)
    jax.block_until_ready((up_inp, up_mask))

    # Reference: numpy nearest upsample == torch F.interpolate(nearest, s=2).
    xn = np.asarray(x)
    mid = C // 2
    ref_inp = np.repeat(np.repeat(xn[:, :C - mid], 2, axis=2), 2, axis=3)
    ref_mask = np.repeat(np.repeat(xn[:, C - mid:], 2, axis=2), 2, axis=3)

    assert up_inp.shape == (N, C - mid, 2 * H, 2 * W)
    assert up_mask.shape == (N, mid, 2 * H, 2 * W)
    np.testing.assert_allclose(np.asarray(up_inp), ref_inp, rtol=1e-6, atol=1e-6)
    np.testing.assert_allclose(np.asarray(up_mask), ref_mask, rtol=1e-6, atol=1e-6)

    # Tuple-input branch of the forward pass.
    t_inp, t_mask = model((x[:, :C - mid], x[:, C - mid:]))
    jax.block_until_ready((t_inp, t_mask))
    np.testing.assert_allclose(np.asarray(t_inp), ref_inp, rtol=1e-6, atol=1e-6)
    np.testing.assert_allclose(np.asarray(t_mask), ref_mask, rtol=1e-6, atol=1e-6)

    print("KERNEL_OK")
</pallas_src>

<mosaic_0001>
module attributes {stable_mosaic.version = 11 : i64} {
  func.func @_upsample_rows_kernel(%arg0: i32, %arg1: memref<32x16xf32, #tpu.memory_space<vmem>>, %arg2: memref<32x64xf32, #tpu.memory_space<vmem>>) attributes {dimension_semantics = [#tpu.dimension_semantics<parallel>], iteration_bounds = array<i64: 2>, scalar_prefetch = 0 : i64, scratch_operands = 0 : i64, tpu.core_type = #tpu.core_type<tc>, window_params = [{transform_indices = @transform_0, window_bounds = array<i64: 32, 16>}, {transform_indices = @transform_1, window_bounds = array<i64: 32, 64>}]} {
    %c0 = arith.constant 0 : index
    %c0_0 = arith.constant 0 : index
    %0 = vector.load %arg1[%c0, %c0_0] : memref<32x16xf32, #tpu.memory_space<vmem>>, vector<32x16xf32>
    %1 = tpu.iota {dimensions = array<i32: 1>} : vector<16x32xi32>
    %2 = tpu.iota {dimensions = array<i32: 0>} : vector<16x32xi32>
    %c2_i32 = arith.constant 2 : i32
    %3 = vector.broadcast %c2_i32 : i32 to vector<16x32xi32>
    %4 = arith.muli %3, %2 : vector<16x32xi32>
    %5 = arith.cmpi sge, %1, %4 : vector<16x32xi32>
    %c1_i32 = arith.constant 1 : i32
    %6 = vector.broadcast %c1_i32 : i32 to vector<16x32xi32>
    %7 = arith.addi %2, %6 : vector<16x32xi32>
    %c2_i32_1 = arith.constant 2 : i32
    %8 = vector.broadcast %c2_i32_1 : i32 to vector<16x32xi32>
    %9 = arith.muli %8, %7 : vector<16x32xi32>
    %10 = arith.cmpi slt, %1, %9 : vector<16x32xi32>
    %11 = arith.andi %5, %10 : vector<16x32xi1>
    %cst = arith.constant 1.000000e+00 : f32
    %cst_2 = arith.constant 0.000000e+00 : f32
    %12 = vector.broadcast %cst : f32 to vector<16x32xf32>
    %13 = vector.broadcast %cst_2 : f32 to vector<16x32xf32>
    %14 = arith.select %11, %12, %13 : vector<16x32xi1>, vector<16x32xf32>
    %15 = arith.truncf %14 : vector<16x32xf32> to vector<16x32xbf16>
    %cst_3 = arith.constant 0.000000e+00 : f32
    %16 = vector.broadcast %cst_3 : f32 to vector<32x32xf32>
    %17 = arith.truncf %0 : vector<32x16xf32> to vector<32x16xbf16>
    %cst_4 = arith.constant dense<0.000000e+00> : vector<32x32xf32>
    %18 = tpu.matmul %17, %15, %cst_4 {dimension_numbers = #tpu.dot_dimension_numbers<[1], [0], [0], [1], [0, 0, 1, 1], [], []>} : vector<32x16xbf16>, vector<16x32xbf16>, vector<32x32xf32> -> vector<32x32xf32>
    %19 = arith.addf %16, %18 : vector<32x32xf32>
    %20 = arith.extf %17 : vector<32x16xbf16> to vector<32x16xf32>
    %21 = arith.subf %0, %20 : vector<32x16xf32>
    %22 = arith.truncf %21 : vector<32x16xf32> to vector<32x16xbf16>
    %cst_5 = arith.constant dense<0.000000e+00> : vector<32x32xf32>
    %23 = tpu.matmul %22, %15, %cst_5 {dimension_numbers = #tpu.dot_dimension_numbers<[1], [0], [0], [1], [0, 0, 1, 1], [], []>} : vector<32x16xbf16>, vector<16x32xbf16>, vector<32x32xf32> -> vector<32x32xf32>
    %24 = arith.addf %19, %23 : vector<32x32xf32>
    %25 = arith.extf %22 : vector<32x16xbf16> to vector<32x16xf32>
    %26 = arith.subf %21, %25 : vector<32x16xf32>
    %27 = arith.truncf %26 : vector<32x16xf32> to vector<32x16xbf16>
    %cst_6 = arith.constant dense<0.000000e+00> : vector<32x32xf32>
    %28 = tpu.matmul %27, %15, %cst_6 {dimension_numbers = #tpu.dot_dimension_numbers<[1], [0], [0], [1], [0, 0, 1, 1], [], []>} : vector<32x16xbf16>, vector<16x32xbf16>, vector<32x32xf32> -> vector<32x32xf32>
    %29 = arith.addf %24, %28 : vector<32x32xf32>
    %30 = tpu.concatenate %29, %29 in 1 : vector<32x32xf32>, vector<32x32xf32> -> vector<32x64xf32>
    %c0_7 = arith.constant 0 : index
    %c0_8 = arith.constant 0 : index
    %31 = vector.load %arg2[%c0_7, %c0_8] : memref<32x64xf32, #tpu.memory_space<vmem>>, vector<32x64xf32>
    tpu.vector_store %arg2[%c0_7, %c0_8], %30 {strides = array<i32>} : memref<32x64xf32, #tpu.memory_space<vmem>>, vector<32x64xf32>,
    return
  }
  func.func @transform_0(%arg0: i32) -> (i32, i32) {
    %c0_i32 = arith.constant 0 : i32
    %c0_i32_0 = arith.constant 0 : i32
    return %arg0, %c0_i32 : i32, i32
  }
  func.func @transform_1(%arg0: i32) -> (i32, i32) {
    %c0_i32 = arith.constant 0 : i32
    %c0_i32_0 = arith.constant 0 : i32
    return %arg0, %c0_i32 : i32, i32
  }
}

</mosaic_0001>

<bundles_post_ra>
// kernel: tpu_custom_call.1
= control target key start
LH: loop header
LB: loop body
LE: loop exit
PB: predicated region body
PF: predicated region fallthrough
CT: control target
= control target key end

     0   :  { %6 = vsyncpa [#allocation3], 0  ;;  %s763_s0 = inlined_call_operand.vmem [shape: f32[64,16], index: 0, kind: input, shape index: {}]   ;;  %s764_s1 = inlined_call_operand.hbm [shape: f32[64,64], index: 1, kind: output, shape index: {}]  }
   0x1   :  { %8 = vsyncpa [#allocation3 + $0x1], 0  ;;  %s619_s6 = smov 0   ;;  %s621_s7 = smov 0  }
   0x2   :  { %s623_s8 = smov 0   ;;  %s625_s9 = smov 0  }
   0x3 LB: > { %s640_s10 = sadd.s32 4294967295, %s602_s9   ;;  %s437_s11 = sadd.s32 4294967294, %s602_s9   ;;  %s602_s9 = sphi %s625_s9, %s776_s9   ;;  %s598_s8 = sphi %s623_s8, %s775_s8   ;;  %s594_s7 = sphi %s621_s7, %s774_s7   ;;  %s590_s6 = sphi %s619_s6, %s773_s6  }
   0x4   : > { %s644_s12 = sadd.s32 1, %s602_s9   ;;  %s47_s13 = sadd.s32 1, %s598_s8 }
   0x5   : > { %s44_s14 = ssub.s32 %s602_s9, %s644_s12  ;;  %p57_p0 = scmp.ne.s32.totalorder %s598_s8, %s594_s7 }
   0x6   : > { %p45_p1 = scmp.eq.s32.totalorder %s44_s14, 0  ;;  %p58_p2 = scmp.eq.s32.totalorder %s640_s10, 1 }
   0x7   : > { %p63_p3 = scmp.ne.s32.totalorder %s594_s7, %s590_s6  ;;  %p64_p4 = scmp.eq.s32.totalorder %s437_s11, 1 }
   0x8   : > { %s655_s15 = scalar_select %p45_p1, %s598_s8, %s47_s13  }
   0x9   : > { %p657_p5 = por %p58_p2, %p57_p0  ;;  %p661_p6 = por %p64_p4, %p63_p3 }
   0xa   : > { %p440_p7 = scmp.ge.s32.totalorder %s602_s9, 1  ;;  %p91_p8 = scmp.lt.s32.totalorder %s602_s9, 3 }
   0xc   : > { %p92_p9 = pnand %p440_p7, %p91_p8 }
   0xd   : > { %v123_v0 = vlaneseq (!%p92_p9)  ;;  %s442_s18 = sshll.u32 (!%p92_p9), %s640_s10, 2  ;;  %vm155_vm1 = vcmask (!%p92_p9), 130048   ;;  %v604_v25 = vmov (!%p92_p9), 1.0|1.0   ;;  %s605_s23 = smov (!%p92_p9), 32   ;;  %vm351_vm8 = vcmask (!%p92_p9), 261120  }
   0xe   : > { %95 = sbr.rel (%p92_p9) target bundleno = 393 (0x189), region = 24  ;;  %p112_p10 = scmp.lt.s32.totalorder (!%p92_p9), %s442_s18, 7  ;;  %vm356_vm9 = vcmask (!%p92_p9), 523264  }
   0xf   : > { %v124_v1 = vand.u32 (!%p92_p9), 127, %v123_v0  ;;  %v126_v2 = vshrl.u32 (!%p92_p9), %v123_v0, 7  ;;  %s108_s24 = sand.u32 (!%p92_p9), 1, %s594_s7   ;;  %s461_s28 = sshll.u32 (!%p92_p9), %s640_s10, 9 }
  0x10   : > { %s441_s25 = sshll.u32 (!%p92_p9), %s108_s24, 5  ;;  %s716_s2 = scalar_lea.hbm (!%p92_p9), %s764_s1, %s461_s28 }
  0x11   : > { %v127_v3 = vadd.s32 (!%p92_p9), 8, %v126_v2  ;;  %v128_v4 = vmul.u32 (!%p92_p9), 2, %v126_v2  ;;  %v132_v5 = vadd.s32 (!%p92_p9), 1, %v126_v2  ;;  %s110_s26 = scalar_lea.vmem (!%p92_p9), [#allocation2], %s441_s25  ;;  %s722_s3 = scalar_lea.sflag (!%p92_p9), [#allocation3], %s108_s24 }
  0x12   : > { %s375_s27 = sshll.u32 (!%p92_p9), %s110_s26, 4  ;;  %s606_s5 = smov (!%p92_p9), [#allocation2]   ;;  %s711_s27 = int_to_ptr.vmem [resolvable:$true] %s375_s27 }
  0x13   : > { %v129_v6 = vmul.u32 (!%p92_p9), 2, %v127_v3  ;;  %vm668_vm0 = vcmp.ge.s32.totalorder (!%p92_p9), %v124_v1, %v128_v4  ;;  %v133_v8 = vadd.s32 (!%p92_p9), 1, %v127_v3  ;;  %v134_v9 = vmul.u32 (!%p92_p9), 2, %v132_v5  ;;  %s540_s4 = scalar_lea.vmem (!%p92_p9), %s711_s27, 512  ;;  %s544_s10 = sshll.u32 (!%p92_p9), %s606_s5, 4  ;;  %s545_s10 = int_to_ptr.vmem [resolvable:$false] %s544_s10 }
  0x14   : > { %p541_p11 = scmp.ne.s32.totalorder (!%p92_p9), %s711_s27, %s540_s4  ;;  %s546_s11 = scalar_lea.vmem (!%p92_p9), %s545_s10, 1024 }
  0x15   : > { %s778_s18 = smov (!%p112_p10, %s442_s18), 7  ;;  %vm675_vm2 = vcmp.ge.s32.totalorder %v124_v1, %v129_v6  ;;  %v135_v14 = vmul.u32 2, %v133_v8  ;;  %vm136_vm3 = vcmp.lt.s32.totalorder %v124_v1, %v134_v9  ;;  %p547_p0 = scmp.lt.s32.totalorder %s711_s27, %s545_s10 }
  0x16   : > { %s443_s19 = sshll.u32 %s778_s18, 3  ;;  %vm138_vm4 = vmand %vm668_vm0, %vm136_vm3  ;;  %p542_p12 = pnand %p541_p11, %p657_p5 }
  0x17   : > { %s115_s22 = scalar_lea.vmem %s763_s0, %s443_s19  ;;  %vm137_vm5 = vcmp.lt.s32.totalorder %v124_v1, %v135_v14  ;;  %p548_p1 = scmp.lt.s32.totalorder %s546_s11, %s540_s4 }
  0x18   : > { %v119_v10 = vld [vmem:[%s115_s22] sm:$0xff]  ;;  %v120_v11 = vld [vmem:[%s115_s22 + $0x8] sm:$0xff]  ;;  %v121_v12 = vld [vmem:[%s115_s22 + $0x10] sm:$0xff]  ;;  %p543_p13 = pneg %p542_p12 }
  0x19   : > { %v143_v15 = vpack.c.bf16 %v120_v11, %v119_v10  ;;  %v122_v16 = vld [vmem:[%s115_s22 + $0x18] sm:$0xff]  ;;  %vm139_vm6 = vmand %vm675_vm2, %vm137_vm5  ;;  %p549_p2 = por %p548_p1, %p547_p0 }
  0x1a   : > { %v144_v17 = vpack.c.bf16 %v122_v16, %v121_v12  ;;  %vm684_vm7 = vmpackc.low %vm139_vm6, %vm138_vm4 }
  0x1b   : > { %479 = vmatprep.mubr.msk.bf16.mxu0 %vm155_vm1, %v143_v15  ;;  %v145_v18 = vunpack.c.l.bf16 %v143_v15  ;;  %v146_v19 = vunpack.c.h.bf16 %v143_v15  ;;  %477 = vmatprep.subr.msk.bf16.mxu0 %vm684_vm7, %v604_v25  ;;  %p550_p3 = pnand %p549_p2, %p543_p13 }
  0x1c   : > { %v147_v20 = vunpack.c.l.bf16 %v144_v17  ;;  %v148_v21 = vunpack.c.h.bf16 %v144_v17  ;;  %471 = vmatprep.subr.msk.bf16.mxu1 %vm684_vm7, %v604_v25  ;;  %478 = vmatpush3.bf16.msk.msra.mxu0 %vm684_vm7, %v604_v25 }
  0x1d   : > { %v149_v23 = vsub.f32 %v119_v10, %v145_v18  ;;  %v150_v24 = vsub.f32 %v120_v11, %v146_v19  ;;  %472 = vmatpush3.bf16.msk.msra.mxu1 %vm684_vm7, %v604_v25  ;;  %483 = vmatprep.subr.msk.bf16.mxu0 %vm684_vm7, %v604_v25 }
  0x1e   : > { %v151_v26 = vsub.f32 %v121_v12, %v147_v20  ;;  %v152_v27 = vsub.f32 %v122_v16, %v148_v21 }
  0x1f   : > { %v153_v28 = vpack.c.bf16 %v150_v24, %v149_v23  ;;  %480 = vmatmul.mubr.msk.bf16.vlgmr.msra.gmra.mrb[0].mxu0 %vm155_vm1, %v144_v17 }
  0x20   : > { %v154_v29 = vpack.c.bf16 %v152_v27, %v151_v26  ;;  %484 = vmatpush3.bf16.msk.msra.mxu0 %vm684_vm7, %v604_v25 }
  0x21   : > { %473 = vmatprep.mubr.msk.bf16.mxu1 %vm155_vm1, %v153_v28  ;;  %v266_v30 = vunpack.c.l.bf16 %v153_v28  ;;  %v267_v31 = vunpack.c.h.bf16 %v153_v28 }
  0x22   : > { %474 = vmatmul.mubr.msk.bf16.vlgmr.msra.gmra.mrb[0].mxu1 %vm155_vm1, %v154_v29  ;;  %v268_v32 = vunpack.c.l.bf16 %v154_v29  ;;  %v269_v33 = vunpack.c.h.bf16 %v154_v29 }
  0x23   : > { %v270_v34 = vsub.f32 %v149_v23, %v266_v30  ;;  %v271_v35 = vsub.f32 %v150_v24, %v267_v31 }
  0x24   : > { %v272_v37 = vsub.f32 %v151_v26, %v268_v32  ;;  %v273_v38 = vsub.f32 %v152_v27, %v269_v33 }
  0x25   : > { %v274_v36 = vpack.c.bf16 %v271_v35, %v270_v34 }
  0x26   : > { %v275_v39 = vpack.c.bf16 %v273_v38, %v272_v37 }
  0x27   : > { %485 = vmatprep.mubr.msk.bf16.mxu0 %vm155_vm1, %v274_v36 }
  0x2b   : > { %486 = vmatmul.mubr.msk.bf16.vlgmr.msra.gmra.mrb[0].mxu0 %vm155_vm1, %v275_v39 }
  0xf5   : > { %v475_v40 = vpop.f32.mrb[0].mxu1 }
  0xf6   : > { %v196_v41 = vpop.f32.mrb[1].mxu1 }
  0xf7   : > { %v476_v42 = vpop.f32.mrb[2].mxu1 }
  0xf8   : > { %v199_v43 = vpop.f32.mrb[3].mxu1 }
  0xfe   : > { %v487_v44 = vpop.f32.mrb[0].mxu0 }
  0xff   : > { %v489_v45 = vadd.f32 %v487_v44, %v475_v40  ;;  %v316_v46 = vpop.f32.mrb[1].mxu0 }
 0x100   : > { %v490_v47 = vadd.f32 %v316_v46, %v196_v41  ;;  %v488_v48 = vpop.f32.mrb[2].mxu0 }
 0x101   : > { %v491_v49 = vadd.f32 %v488_v48, %v476_v42  ;;  %v319_v50 = vpop.f32.mrb[3].mxu0  ;;  %343 = vrot.lane.b32.xlu1 %v489_v45, %s605_s23 }
 0x102   : > { %v492_v51 = vadd.f32 %v319_v50, %v199_v43  ;;  %339 = vrot.lane.b32.xlu0 %v490_v47, %s605_s23 }
 0x105   : > { %345 = vrot.lane.b32.xlu1 %v491_v49, %s605_s23 }
 0x106   : > { %341 = vrot.lane.b32.xlu0 %v492_v51, %s605_s23 }
 0x173   : > { %v344_v52 = vpop.permute.xlu1 %343 }
 0x174   : > { %v354_v53 = vsel %vm351_vm8, %v489_v45, %v344_v52  ;;  %v340_v54 = vpop.permute.xlu0 %339 }
 0x175   : > { %359 = vst.msk [vmem:[%s110_s26 + $0x10] sm:$0xff] %vm356_vm9, %v354_v53  ;;  %v352_v55 = vsel %vm351_vm8, %v490_v47, %v340_v54 }
 0x176   : > { %357 = vst.msk [vmem:[%s110_s26] sm:$0xff] %vm356_vm9, %v352_v55 }
 0x177   : > { %v346_v56 = vpop.permute.xlu1 %345 }
 0x178   : > { %v355_v57 = vsel %vm351_vm8, %v491_v49, %v346_v56  ;;  %v342_v58 = vpop.permute.xlu0 %341 }
 0x179   : > { %360 = vst.msk [vmem:[%s110_s26 + $0x18] sm:$0xff] %vm356_vm9, %v355_v57  ;;  %v353_v59 = vsel %vm351_vm8, %v492_v51, %v342_v58 }
 0x17a   : > { %358 = vst.msk [vmem:[%s110_s26 + $0x8] sm:$0xff] %vm356_vm9, %v353_v59 }
 0x17b   : > { %553 = shalt.err (!%p550_p3)
}
 0x17c   : > { %s554_s13 = scalar_lea.hbm %s716_s2, 512  ;;  %s558_s19 = scalar_lea.hbm %s764_s1, 1024 }
 0x17d   : > { %p555_p4 = scmp.ne.s32.totalorder %s716_s2, %s554_s13  ;;  %p559_p9 = scmp.lt.u32.totalorder %s716_s2, %s764_s1 }
 0x17e   : > { %p560_p10 = scmp.lt.u32.totalorder %s558_s19, %s554_s13  ;;  %p562_p12 = scmp.lt.u32.totalorder %s554_s13, %s716_s2 }
 0x17f   : > { %p556_p7 = pnand %p555_p4, %p657_p5 }
 0x180   : > { %p561_p11 = por %p560_p10, %p559_p9 }
 0x181   : > { %p557_p8 = pneg %p556_p7 }
 0x182   : > { %p563_p13 = por %p562_p12, %p561_p11 }
 0x184   : > { %p564_p0 = pnand %p563_p13, %p557_p8 }
 0x186   : > { %567 = shalt.err (!%p564_p0)
}
 0x187   : > { %s607_s22 = smov 128   ;;  %s608_s23 = smov 8  }
 0x188   : > { %497 = dma.vmem_to_hbm [thread:$0]  (%p657_p5), %s711_s27, 512, %s716_s2, %s722_s3, %s607_s22, %s607_s22, %s608_s23  }
 0x189 PF: > { %p503_p1 = scmp.ge.s32.totalorder %s602_s9, 2  ;;  %s390_s24 = sand.u32 1, %s590_s6  }
 0x18a   : > { %s391_s25 = scalar_lea.sflag [#allocation3], %s390_s24 }
 0x18b   : > { %p500_p2 = pnand %p503_p1, %p661_p6 }
 0x18d   : > { %585 = dma.done.wait (!%p500_p2), %s391_s25, 512  }
 0x18e   : > { %587 = vsyncadd (!%p500_p2), %s391_s25, 4294966784  ;;  %p11_p3 = scmp.ge.s32.totalorder %s644_s12, 4   ;;  %s773_s6 = smov %s594_s7 }
 0x18f   : > { %s774_s7 = smov %s598_s8  ;;  %s775_s8 = smov %s655_s15 }
 0x190   : > { %s776_s9 = smov %s644_s12  ;;  %13 = sbr.rel (!%p11_p3) target bundleno = 3 (0x3), region = 59 }
 0x197   :  { %396 = vsyncpa [#allocation3], 1 }
 0x198   :  { %398 = vsyncpa [#allocation3 + $0x1], 1 }

</bundles_post_ra>
